<compile_context>
chip_gen: v7x
topology: tpu7x:2x2x1
jax: 0.10.0
libtpu: 0.0.40
codegen_flags: <defaults>
</compile_context>

<pallas_src>
import jax
import jax.numpy as jnp
from jax.experimental import pallas as pl
from jax.experimental.pallas import tpu as pltpu

INPUT_SIZE = 784
H1, H2, H3 = 50, 100, 50
NUM_CLASSES = 10
OUT_PAD = 128  # lane-dense padded output width (full vreg lane width)


def mlp_kernel(x_ref, w1_ref, b1_ref, w2_ref, b2_ref,
               w3_ref, b3_ref, w4_ref, b4_ref, o_ref):
    # Four matmuls + bias + ReLU chained on the MXU/VPU, fully in VMEM.
    x = x_ref[...]
    h = jnp.dot(x, w1_ref[...], preferred_element_type=jnp.float32) + b1_ref[...]
    h = jnp.maximum(h, 0.0)
    h = jnp.dot(h, w2_ref[...], preferred_element_type=jnp.float32) + b2_ref[...]
    h = jnp.maximum(h, 0.0)
    h = jnp.dot(h, w3_ref[...], preferred_element_type=jnp.float32) + b3_ref[...]
    h = jnp.maximum(h, 0.0)
    out = jnp.dot(h, w4_ref[...], preferred_element_type=jnp.float32) + b4_ref[...]
    o_ref[...] = out.astype(o_ref.dtype)


def _choose_bm(batch, max_bm=512):
    """Pick the batch tile: 512 rows when the batch is large (near HBM roofline),
    otherwise shrink so the grid still has >= 2 steps (megacore / pipelining),
    keeping the tile a multiple of 8 (f32 sublane tiling)."""
    if batch >= 2 * max_bm:
        return max_bm
    bm = -(-batch // 2)                # ceil(batch / 2)
    bm = max(8, ((bm + 7) // 8) * 8)   # round up to a multiple of 8
    return min(bm, max_bm)


def mlp_forward(x, params, *, bm=None):
    """x: (B, 784) float32. params: dict of weights/biases. Returns (B, 10)."""
    B, D = x.shape
    assert D == INPUT_SIZE

    if bm is None:
        bm = _choose_bm(B)

    # Pad the batch up to a multiple of the tile; padded rows are discarded below.
    B_pad = ((B + bm - 1) // bm) * bm
    x_in = jnp.pad(x, ((0, B_pad - B), (0, 0))) if B_pad != B else x

    w1, b1 = params["w1"], params["b1"]
    w2, b2 = params["w2"], params["b2"]
    w3, b3 = params["w3"], params["b3"]
    w4, b4 = params["w4"], params["b4"]

    # Lane-dense output store: pad the 10-wide classifier to 128 columns.
    w4p = jnp.pad(w4, ((0, 0), (0, OUT_PAD - NUM_CLASSES)))
    b4p = jnp.pad(b4, ((0, 0), (0, OUT_PAD - NUM_CLASSES)))

    # Weights/biases are small (~181 KB); constant index_map keeps them resident.
    full = lambda shape: pl.BlockSpec(shape, lambda i: (0, 0))

    out_padded = pl.pallas_call(
        mlp_kernel,
        out_shape=jax.ShapeDtypeStruct((B_pad, OUT_PAD), jnp.float32),
        grid_spec=pltpu.PrefetchScalarGridSpec(
            num_scalar_prefetch=0,
            grid=(B_pad // bm,),
            in_specs=[
                pl.BlockSpec((bm, INPUT_SIZE), lambda i: (i, 0)),  # x tile
                full(w1.shape), full(b1.shape),
                full(w2.shape), full(b2.shape),
                full(w3.shape), full(b3.shape),
                full(w4p.shape), full(b4p.shape),
            ],
            out_specs=pl.BlockSpec((bm, OUT_PAD), lambda i: (i, 0)),
        ),
        compiler_params=pltpu.CompilerParams(
            dimension_semantics=("parallel",),
            vmem_limit_bytes=48 * 1024 * 1024,  # plenty of headroom; < v7x 64 MiB
        ),
    )(x_in, w1, b1, w2, b2, w3, b3, w4p, b4p)

    return out_padded[:B, :NUM_CLASSES]


def init_params(key):
    """Deterministic init mimicking nn.Linear's U(-1/sqrt(fan_in), +1/sqrt(fan_in))."""
    dims = [(INPUT_SIZE, H1), (H1, H2), (H2, H3), (H3, NUM_CLASSES)]
    params = {}
    keys = jax.random.split(key, 2 * len(dims))
    for idx, (fan_in, fan_out) in enumerate(dims):
        bound = 1.0 / (fan_in ** 0.5)
        w = jax.random.uniform(keys[2 * idx], (fan_in, fan_out),
                               minval=-bound, maxval=bound, dtype=jnp.float32)
        b = jax.random.uniform(keys[2 * idx + 1], (1, fan_out),
                               minval=-bound, maxval=bound, dtype=jnp.float32)
        params[f"w{idx + 1}"] = w
        params[f"b{idx + 1}"] = b
    return params


def reference_forward(x, params):
    h = jnp.maximum(x @ params["w1"] + params["b1"], 0.0)
    h = jnp.maximum(h @ params["w2"] + params["b2"], 0.0)
    h = jnp.maximum(h @ params["w3"] + params["b3"], 0.0)
    return h @ params["w4"] + params["b4"]


if __name__ == "__main__":
    key = jax.random.PRNGKey(0)
    k_params, k_x1, k_x2 = jax.random.split(key, 3)

    params = init_params(k_params)

    # Small, tile-divisible batch (2 grid steps of bm=8).
    x16 = jax.random.normal(k_x1, (16, INPUT_SIZE), dtype=jnp.float32)
    out16 = jax.block_until_ready(mlp_forward(x16, params))
    ref16 = reference_forward(x16, params)
    assert out16.shape == (16, NUM_CLASSES)
    assert jnp.allclose(out16, ref16, atol=1e-4, rtol=1e-4), "mismatch vs reference (B=16)"

    # Ragged batch to exercise the padding path (no longer asserts on B % bm).
    x13 = jax.random.normal(k_x2, (13, INPUT_SIZE), dtype=jnp.float32)
    out13 = jax.block_until_ready(mlp_forward(x13, params))
    ref13 = reference_forward(x13, params)
    assert out13.shape == (13, NUM_CLASSES)
    assert jnp.allclose(out13, ref13, atol=1e-4, rtol=1e-4), "mismatch vs reference (B=13)"

    print("KERNEL_OK")
</pallas_src>

<mosaic_0001>
module attributes {stable_mosaic.version = 11 : i64} {
  func.func @mlp_kernel(%arg0: i32, %arg1: memref<8x784xf32, #tpu.memory_space<vmem>>, %arg2: memref<784x50xf32, #tpu.memory_space<vmem>>, %arg3: memref<1x50xf32, #tpu.memory_space<vmem>>, %arg4: memref<50x100xf32, #tpu.memory_space<vmem>>, %arg5: memref<1x100xf32, #tpu.memory_space<vmem>>, %arg6: memref<100x50xf32, #tpu.memory_space<vmem>>, %arg7: memref<1x50xf32, #tpu.memory_space<vmem>>, %arg8: memref<50x128xf32, #tpu.memory_space<vmem>>, %arg9: memref<1x128xf32, #tpu.memory_space<vmem>>, %arg10: memref<8x128xf32, #tpu.memory_space<vmem>>) attributes {dimension_semantics = [#tpu.dimension_semantics<parallel>], iteration_bounds = array<i64: 2>, scalar_prefetch = 0 : i64, scratch_operands = 0 : i64, tpu.core_type = #tpu.core_type<tc>, window_params = [{transform_indices = @transform_0, window_bounds = array<i64: 8, 784>}, {pipeline_mode = #tpu.pipeline_mode<synchronous>, transform_indices = @transform_1, window_bounds = array<i64: 784, 50>}, {pipeline_mode = #tpu.pipeline_mode<synchronous>, transform_indices = @transform_2, window_bounds = array<i64: 1, 50>}, {pipeline_mode = #tpu.pipeline_mode<synchronous>, transform_indices = @transform_3, window_bounds = array<i64: 50, 100>}, {pipeline_mode = #tpu.pipeline_mode<synchronous>, transform_indices = @transform_4, window_bounds = array<i64: 1, 100>}, {pipeline_mode = #tpu.pipeline_mode<synchronous>, transform_indices = @transform_5, window_bounds = array<i64: 100, 50>}, {pipeline_mode = #tpu.pipeline_mode<synchronous>, transform_indices = @transform_6, window_bounds = array<i64: 1, 50>}, {pipeline_mode = #tpu.pipeline_mode<synchronous>, transform_indices = @transform_7, window_bounds = array<i64: 50, 128>}, {pipeline_mode = #tpu.pipeline_mode<synchronous>, transform_indices = @transform_8, window_bounds = array<i64: 1, 128>}, {transform_indices = @transform_9, window_bounds = array<i64: 8, 128>}]} {
    %c0 = arith.constant 0 : index
    %c0_0 = arith.constant 0 : index
    %0 = vector.load %arg1[%c0, %c0_0] : memref<8x784xf32, #tpu.memory_space<vmem>>, vector<8x784xf32>
    %c0_1 = arith.constant 0 : index
    %c0_2 = arith.constant 0 : index
    %1 = vector.load %arg2[%c0_1, %c0_2] : memref<784x50xf32, #tpu.memory_space<vmem>>, vector<784x50xf32>
    %cst = arith.constant dense<0.000000e+00> : vector<8x50xf32>
    %2 = tpu.matmul %0, %1, %cst {dimension_numbers = #tpu.dot_dimension_numbers<[1], [0], [0], [1], [0, 0, 1, 1], [], []>} : vector<8x784xf32>, vector<784x50xf32>, vector<8x50xf32> -> vector<8x50xf32>
    %c0_3 = arith.constant 0 : index
    %c0_4 = arith.constant 0 : index
    %3 = vector.load %arg3[%c0_3, %c0_4] : memref<1x50xf32, #tpu.memory_space<vmem>>, vector<1x50xf32>
    %4 = vector.broadcast %3 : vector<1x50xf32> to vector<8x50xf32>
    %5 = arith.addf %2, %4 : vector<8x50xf32>
    %cst_5 = arith.constant 0.000000e+00 : f32
    %6 = vector.broadcast %cst_5 : f32 to vector<8x50xf32>
    %7 = arith.maximumf %5, %6 : vector<8x50xf32>
    %c0_6 = arith.constant 0 : index
    %c0_7 = arith.constant 0 : index
    %8 = vector.load %arg4[%c0_6, %c0_7] : memref<50x100xf32, #tpu.memory_space<vmem>>, vector<50x100xf32>
    %cst_8 = arith.constant dense<0.000000e+00> : vector<8x100xf32>
    %9 = tpu.matmul %7, %8, %cst_8 {dimension_numbers = #tpu.dot_dimension_numbers<[1], [0], [0], [1], [0, 0, 1, 1], [], []>} : vector<8x50xf32>, vector<50x100xf32>, vector<8x100xf32> -> vector<8x100xf32>
    %c0_9 = arith.constant 0 : index
    %c0_10 = arith.constant 0 : index
    %10 = vector.load %arg5[%c0_9, %c0_10] : memref<1x100xf32, #tpu.memory_space<vmem>>, vector<1x100xf32>
    %11 = vector.broadcast %10 : vector<1x100xf32> to vector<8x100xf32>
    %12 = arith.addf %9, %11 : vector<8x100xf32>
    %cst_11 = arith.constant 0.000000e+00 : f32
    %13 = vector.broadcast %cst_11 : f32 to vector<8x100xf32>
    %14 = arith.maximumf %12, %13 : vector<8x100xf32>
    %c0_12 = arith.constant 0 : index
    %c0_13 = arith.constant 0 : index
    %15 = vector.load %arg6[%c0_12, %c0_13] : memref<100x50xf32, #tpu.memory_space<vmem>>, vector<100x50xf32>
    %cst_14 = arith.constant dense<0.000000e+00> : vector<8x50xf32>
    %16 = tpu.matmul %14, %15, %cst_14 {dimension_numbers = #tpu.dot_dimension_numbers<[1], [0], [0], [1], [0, 0, 1, 1], [], []>} : vector<8x100xf32>, vector<100x50xf32>, vector<8x50xf32> -> vector<8x50xf32>
    %c0_15 = arith.constant 0 : index
    %c0_16 = arith.constant 0 : index
    %17 = vector.load %arg7[%c0_15, %c0_16] : memref<1x50xf32, #tpu.memory_space<vmem>>, vector<1x50xf32>
    %18 = vector.broadcast %17 : vector<1x50xf32> to vector<8x50xf32>
    %19 = arith.addf %16, %18 : vector<8x50xf32>
    %cst_17 = arith.constant 0.000000e+00 : f32
    %20 = vector.broadcast %cst_17 : f32 to vector<8x50xf32>
    %21 = arith.maximumf %19, %20 : vector<8x50xf32>
    %c0_18 = arith.constant 0 : index
    %c0_19 = arith.constant 0 : index
    %22 = vector.load %arg8[%c0_18, %c0_19] : memref<50x128xf32, #tpu.memory_space<vmem>>, vector<50x128xf32>
    %cst_20 = arith.constant dense<0.000000e+00> : vector<8x128xf32>
    %23 = tpu.matmul %21, %22, %cst_20 {dimension_numbers = #tpu.dot_dimension_numbers<[1], [0], [0], [1], [0, 0, 1, 1], [], []>} : vector<8x50xf32>, vector<50x128xf32>, vector<8x128xf32> -> vector<8x128xf32>
    %c0_21 = arith.constant 0 : index
    %c0_22 = arith.constant 0 : index
    %24 = vector.load %arg9[%c0_21, %c0_22] : memref<1x128xf32, #tpu.memory_space<vmem>>, vector<1x128xf32>
    %25 = vector.broadcast %24 : vector<1x128xf32> to vector<8x128xf32>
    %26 = arith.addf %23, %25 : vector<8x128xf32>
    %c0_23 = arith.constant 0 : index
    %c0_24 = arith.constant 0 : index
    %27 = vector.load %arg10[%c0_23, %c0_24] : memref<8x128xf32, #tpu.memory_space<vmem>>, vector<8x128xf32>
    tpu.vector_store %arg10[%c0_23, %c0_24], %26 {strides = array<i32>} : memref<8x128xf32, #tpu.memory_space<vmem>>, vector<8x128xf32>,
    return
  }
  func.func @transform_0(%arg0: i32) -> (i32, i32) {
    %c0_i32 = arith.constant 0 : i32
    %c0_i32_0 = arith.constant 0 : i32
    return %arg0, %c0_i32 : i32, i32
  }
  func.func @transform_1(%arg0: i32) -> (i32, i32) {
    %c0_i32 = arith.constant 0 : i32
    %c0_i32_0 = arith.constant 0 : i32
    %c0_i32_1 = arith.constant 0 : i32
    return %c0_i32, %c0_i32_0 : i32, i32
  }
  func.func @transform_2(%arg0: i32) -> (i32, i32) {
    %c0_i32 = arith.constant 0 : i32
    %c0_i32_0 = arith.constant 0 : i32
    %c0_i32_1 = arith.constant 0 : i32
    return %c0_i32, %c0_i32_0 : i32, i32
  }
  func.func @transform_3(%arg0: i32) -> (i32, i32) {
    %c0_i32 = arith.constant 0 : i32
    %c0_i32_0 = arith.constant 0 : i32
    %c0_i32_1 = arith.constant 0 : i32
    return %c0_i32, %c0_i32_0 : i32, i32
  }
  func.func @transform_4(%arg0: i32) -> (i32, i32) {
    %c0_i32 = arith.constant 0 : i32
    %c0_i32_0 = arith.constant 0 : i32
    %c0_i32_1 = arith.constant 0 : i32
    return %c0_i32, %c0_i32_0 : i32, i32
  }
  func.func @transform_5(%arg0: i32) -> (i32, i32) {
    %c0_i32 = arith.constant 0 : i32
    %c0_i32_0 = arith.constant 0 : i32
    %c0_i32_1 = arith.constant 0 : i32
    return %c0_i32, %c0_i32_0 : i32, i32
  }
  func.func @transform_6(%arg0: i32) -> (i32, i32) {
    %c0_i32 = arith.constant 0 : i32
    %c0_i32_0 = arith.constant 0 : i32
    %c0_i32_1 = arith.constant 0 : i32
    return %c0_i32, %c0_i32_0 : i32, i32
  }
  func.func @transform_7(%arg0: i32) -> (i32, i32) {
    %c0_i32 = arith.constant 0 : i32
    %c0_i32_0 = arith.constant 0 : i32
    %c0_i32_1 = arith.constant 0 : i32
    return %c0_i32, %c0_i32_0 : i32, i32
  }
  func.func @transform_8(%arg0: i32) -> (i32, i32) {
    %c0_i32 = arith.constant 0 : i32
    %c0_i32_0 = arith.constant 0 : i32
    %c0_i32_1 = arith.constant 0 : i32
    return %c0_i32, %c0_i32_0 : i32, i32
  }
  func.func @transform_9(%arg0: i32) -> (i32, i32) {
    %c0_i32 = arith.constant 0 : i32
    %c0_i32_0 = arith.constant 0 : i32
    return %arg0, %c0_i32 : i32, i32
  }
}

</mosaic_0001>

<bundles_post_ra>
// kernel: tpu_custom_call.1
= control target key start
LH: loop header
LB: loop body
LE: loop exit
PB: predicated region body
PF: predicated region fallthrough
CT: control target
= control target key end

     0   :  { %14 = vsyncpa [#allocation3], 0  ;;  %s2138_s0 = inlined_call_operand.vmem [shape: f32[16,784], index: 0, kind: input, shape index: {}]   ;;  %s2139_s1 = inlined_call_operand.vmem [shape: f32[784,50], index: 1, kind: input, shape index: {}]   ;;  %s2140_s2 = inlined_call_operand.vmem [shape: f32[1,50], index: 2, kind: input, shape index: {}]   ;;  %s2141_s3 = inlined_call_operand.vmem [shape: f32[50,100], index: 3, kind: input, shape index: {}]   ;;  %s2142_s4 = inlined_call_operand.vmem [shape: f32[1,100], index: 4, kind: input, shape index: {}]   ;;  %s2143_s5 = inlined_call_operand.vmem [shape: f32[100,50], index: 5, kind: input, shape index: {}]   ;;  %s2144_s6 = inlined_call_operand.vmem [shape: f32[1,50], index: 6, kind: input, shape index: {}]   ;;  %s2145_s7 = inlined_call_operand.vmem [shape: f32[50,128], index: 7, kind: input, shape index: {}]   ;;  %s2146_s8 = inlined_call_operand.vmem [shape: f32[1,128], index: 8, kind: input, shape index: {}]   ;;  %s2147_s9 = inlined_call_operand.hbm [shape: f32[16,128], index: 9, kind: output, shape index: {}]  }
   0x1   :  { %16 = vsyncpa [#allocation3 + $0x1], 0  ;;  %s1609_s30 = smov 0   ;;  %s1611_s10 = smov 0  }
   0x2   :  { %s1613_s11 = smov 0   ;;  %s1615_s12 = smov 0  }
   0x3 LB: > { %s1630_s13 = sadd.s32 4294967295, %s1553_s12   ;;  %s1084_s14 = sadd.s32 4294967294, %s1553_s12   ;;  %s1553_s12 = sphi %s1615_s12, %s2153_s12   ;;  %s1549_s11 = sphi %s1613_s11, %s2152_s11   ;;  %s1545_s10 = sphi %s1611_s10, %s2151_s10   ;;  %s1541_s30 = sphi %s1609_s30, %s2150_s30  }
   0x4   : > { %s1634_s15 = sadd.s32 1, %s1553_s12   ;;  %s223_s16 = sadd.s32 1, %s1549_s11 }
   0x5   : > { %s220_s17 = ssub.s32 %s1553_s12, %s1634_s15  ;;  %p233_p0 = scmp.ne.s32.totalorder %s1549_s11, %s1545_s10 }
   0x6   : > { %p221_p1 = scmp.eq.s32.totalorder %s220_s17, 0  ;;  %p234_p2 = scmp.eq.s32.totalorder %s1630_s13, 1 }
   0x7   : > { %p239_p3 = scmp.ne.s32.totalorder %s1545_s10, %s1541_s30  ;;  %p240_p4 = scmp.eq.s32.totalorder %s1084_s14, 1 }
   0x8   : > { %s1645_s18 = scalar_select %p221_p1, %s1549_s11, %s223_s16  }
   0x9   : > { %p1647_p5 = por %p234_p2, %p233_p0  ;;  %p1651_p6 = por %p240_p4, %p239_p3 }
   0xa   : > { %p1087_p7 = scmp.ge.s32.totalorder %s1553_s12, 1  ;;  %p290_p8 = scmp.lt.s32.totalorder %s1553_s12, 3 }
   0xc   : > { %p291_p9 = pnand %p1087_p7, %p290_p8 }
   0xd   : > { %v354_v0 = vld [vmem:[%s2139_s1 + $0x80] sm:$0xff] (!%p291_p9)  ;;  %v355_v1 = vld [vmem:[%s2139_s1 + $0x88] sm:$0xff] (!%p291_p9)  ;;  %v356_v11 = vld [vmem:[%s2139_s1 + $0x90] sm:$0xff] (!%p291_p9)  ;;  %p326_p10 = scmp.lt.s32.totalorder (!%p291_p9), %s1630_s13, 1  ;;  %vm1556_vm0 = vmmov (!%p291_p9), 0   ;;  %vm443_vm1 = vcmask (!%p291_p9), 130048  }
   0xe   : > { %294 = sbr.rel (%p291_p9) target bundleno = 961 (0x3c1), region = 56  ;;  %v338_v2 = vld [vmem:[%s2139_s1] sm:$0xff] (!%p291_p9)  ;;  %v1313_v3 = vpack.c.bf16 (!%p291_p9), %v355_v1, %v354_v0  ;;  %v339_v4 = vld [vmem:[%s2139_s1 + $0x8] sm:$0xff] (!%p291_p9)  ;;  %v357_v13 = vld [vmem:[%s2139_s1 + $0x98] sm:$0xff] (!%p291_p9)  ;;  %vm746_vm2 = vcmask (!%p291_p9), 1041408   ;;  %vm742_vm3 = vcmask (!%p291_p9), 408576  }
   0xf   : > { %v386_v5 = vld [vmem:[%s2139_s1 + $0x180] sm:$0xff] (!%p291_p9)  ;;  %v387_v6 = vld [vmem:[%s2139_s1 + $0x188] sm:$0xff] (!%p291_p9)  ;;  %v1315_v7 = vpack.c.bf16 (!%p291_p9), %v339_v4, %v338_v2  ;;  %v340_v14 = vld [vmem:[%s2139_s1 + $0x10] sm:$0xff] (!%p291_p9)  ;;  %v1317_v16 = vpack.c.bf16 (!%p291_p9), %v357_v13, %v356_v11  ;;  %vm845_vm4 = vcmask (!%p291_p9), 1043456   ;;  %vm841_vm5 = vcmask (!%p291_p9), 818176   ;;  %s323_s14 = sand.u32 (!%p291_p9), 1, %s1545_s10  }
  0x10   : > { %v1345_v8 = vpack.c.bf16 (!%p291_p9), %v387_v6, %v386_v5  ;;  %v370_v9 = vld [vmem:[%s2139_s1 + $0x100] sm:$0xff] (!%p291_p9)  ;;  %v371_v10 = vld [vmem:[%s2139_s1 + $0x108] sm:$0xff] (!%p291_p9)  ;;  %1314 = vmatprep.subr.bf16.mxu0 (!%p291_p9), %v1313_v3  ;;  %v341_v15 = vld [vmem:[%s2139_s1 + $0x18] sm:$0xff] (!%p291_p9)  ;;  %s1088_s16 = sshll.u32 (!%p291_p9), %s323_s14, 3  ;;  %s1102_s23 = sshll.u32 (!%p291_p9), %s1630_s13, 7 }
  0x11   : > { %v1347_v12 = vpack.c.bf16 (!%p291_p9), %v371_v10, %v370_v9  ;;  %1316 = vmatpush3.bf16.msra.mxu0 (!%p291_p9), %v1315_v7  ;;  %v1319_v17 = vpack.c.bf16 (!%p291_p9), %v341_v15, %v340_v14  ;;  %v388_v18 = vld [vmem:[%s2139_s1 + $0x190] sm:$0xff] (!%p291_p9)  ;;  %v389_v19 = vld [vmem:[%s2139_s1 + $0x198] sm:$0xff] (!%p291_p9)  ;;  %v358_v23 = vld [vmem:[%s2139_s1 + $0xa0] sm:$0xff] (!%p291_p9)  ;;  %s2096_s27 = scalar_lea.hbm (!%p291_p9), %s2147_s9, %s1102_s23 }
  0x12   : > { %1346 = vmatprep.subr.bf16.mxu1 (!%p291_p9), %v1345_v8  ;;  %v372_v20 = vld [vmem:[%s2139_s1 + $0x110] sm:$0xff] (!%p291_p9)  ;;  %v1349_v21 = vpack.c.bf16 (!%p291_p9), %v389_v19, %v388_v18  ;;  %v373_v22 = vld [vmem:[%s2139_s1 + $0x118] sm:$0xff] (!%p291_p9)  ;;  %v359_v24 = vld [vmem:[%s2139_s1 + $0xa8] sm:$0xff] (!%p291_p9)  ;;  %1318 = vmatprep.subr.bf16.mxu0 (!%p291_p9), %v1317_v16 }
  0x13   : > { %1348 = vmatpush3.bf16.msra.mxu1 (!%p291_p9), %v1347_v12  ;;  %v1351_v25 = vpack.c.bf16 (!%p291_p9), %v373_v22, %v372_v20  ;;  %v1321_v26 = vpack.c.bf16 (!%p291_p9), %v359_v24, %v358_v23  ;;  %v342_v27 = vld [vmem:[%s2139_s1 + $0x20] sm:$0xff] (!%p291_p9)  ;;  %v343_v28 = vld [vmem:[%s2139_s1 + $0x28] sm:$0xff] (!%p291_p9)  ;;  %v360_v35 = vld [vmem:[%s2139_s1 + $0xb0] sm:$0xff] (!%p291_p9) }
  0x14   : > { %v390_v29 = vld [vmem:[%s2139_s1 + $0x1a0] sm:$0xff] (!%p291_p9)  ;;  %1350 = vmatprep.subr.bf16.mxu1 (!%p291_p9), %v1349_v21  ;;  %v391_v30 = vld [vmem:[%s2139_s1 + $0x1a8] sm:$0xff] (!%p291_p9)  ;;  %v1323_v33 = vpack.c.bf16 (!%p291_p9), %v343_v28, %v342_v27  ;;  %v361_v36 = vld [vmem:[%s2139_s1 + $0xb8] sm:$0xff] (!%p291_p9) }
  0x15   : > { %v374_v31 = vld [vmem:[%s2139_s1 + $0x120] sm:$0xff]  ;;  %v375_v32 = vld [vmem:[%s2139_s1 + $0x128] sm:$0xff]  ;;  %1320 = vmatpush3.bf16.msra.mxu0 %v1319_v17  ;;  %v1353_v34 = vpack.c.bf16 %v391_v30, %v390_v29  ;;  %v344_v37 = vld [vmem:[%s2139_s1 + $0x30] sm:$0xff]  ;;  %v1325_v39 = vpack.c.bf16 %v361_v36, %v360_v35  ;;  %s1751_s21 = scalar_select %p326_p10, %s1630_s13, 1 }
  0x16   : > { %1322 = vmatprep.subr.bf16.mxu0 %v1321_v26  ;;  %v1355_v38 = vpack.c.bf16 %v375_v32, %v374_v31  ;;  %v345_v40 = vld [vmem:[%s2139_s1 + $0x38] sm:$0xff]  ;;  %v392_v41 = vld [vmem:[%s2139_s1 + $0x1b0] sm:$0xff]  ;;  %v362_v46 = vld [vmem:[%s2139_s1 + $0xc0] sm:$0xff]  ;;  %s1558_s13 = smov [#allocation2]  }
  0x17   : > { %1352 = vmatpush3.bf16.msra.mxu1 %v1351_v25  ;;  %v393_v42 = vld [vmem:[%s2139_s1 + $0x1b8] sm:$0xff]  ;;  %v376_v44 = vld [vmem:[%s2139_s1 + $0x130] sm:$0xff]  ;;  %v363_v47 = vld [vmem:[%s2139_s1 + $0xc8] sm:$0xff]  ;;  %v1327_v48 = vpack.c.bf16 %v345_v40, %v344_v37  ;;  %s1448_s29 = smul.u32 56, %s1751_s21  ;;  %s1012_s21 = scalar_lea.sflag [#allocation3], %s323_s14 }
  0x18   : > { %1354 = vmatprep.subr.bf16.mxu1 %v1353_v34  ;;  %v1357_v43 = vpack.c.bf16 %v393_v42, %v392_v41  ;;  %v377_v45 = vld [vmem:[%s2139_s1 + $0x138] sm:$0xff]  ;;  %v394_v49 = vld [vmem:[%s2139_s1 + $0x1c0] sm:$0xff]  ;;  %v395_v50 = vld [vmem:[%s2139_s1 + $0x1c8] sm:$0xff]  ;;  %v1329_v52 = vpack.c.bf16 %v363_v47, %v362_v46 }
  0x19   : > { %1324 = vmatpush3.bf16.msra.mxu0 %v1323_v33  ;;  %v1359_v51 = vpack.c.bf16 %v377_v45, %v376_v44  ;;  %v346_v53 = vld [vmem:[%s2139_s1 + $0x40] sm:$0xff]  ;;  %v347_v54 = vld [vmem:[%s2139_s1 + $0x48] sm:$0xff]  ;;  %v1361_v56 = vpack.c.bf16 %v395_v50, %v394_v49  ;;  %v364_v58 = vld [vmem:[%s2139_s1 + $0xd0] sm:$0xff]  ;;  %s1808_s26 = scalar_lea.vmem %s2138_s0, %s1448_s29  ;;  %v1555_v50 = vmov 0.0|0.0  }
  0x1a   : > { %1326 = vmatprep.subr.bf16.mxu0 %v1325_v39  ;;  %v378_v55 = vld [vmem:[%s2139_s1 + $0x140] sm:$0xff]  ;;  %v379_v57 = vld [vmem:[%s2139_s1 + $0x148] sm:$0xff]  ;;  %v365_v59 = vld [vmem:[%s2139_s1 + $0xd8] sm:$0xff]  ;;  %v1331_v62 = vpack.c.bf16 %v347_v54, %v346_v53 }
  0x1b   : > { %1356 = vmatpush3.bf16.msra.mxu1 %v1355_v38  ;;  %v396_v60 = vld [vmem:[%s2139_s1 + $0x1d0] sm:$0xff]  ;;  %v397_v61 = vld [vmem:[%s2139_s1 + $0x1d8] sm:$0xff]  ;;  %v1363_v63 = vpack.c.bf16 %v379_v57, %v378_v55  ;;  %v1333_v0 = vpack.c.bf16 %v365_v59, %v364_v58  ;;  %v366_v6 = vld [vmem:[%s2139_s1 + $0xe0] sm:$0xff] }
  0x1c   : > { %1358 = vmatprep.subr.bf16.mxu1 %v1357_v43  ;;  %v348_v1 = vld [vmem:[%s2139_s1 + $0x50] sm:$0xff]  ;;  %v349_v2 = vld [vmem:[%s2139_s1 + $0x58] sm:$0xff]  ;;  %v1365_v4 = vpack.c.bf16 %v397_v61, %v396_v60  ;;  %v367_v7 = vld [vmem:[%s2139_s1 + $0xe8] sm:$0xff]  ;;  %v1557_v60 = vmov 0.0  }
  0x1d   : > { %1328 = vmatpush3.bf16.msra.mxu0 %v1327_v48  ;;  %v380_v3 = vld [vmem:[%s2139_s1 + $0x150] sm:$0xff]  ;;  %v381_v5 = vld [vmem:[%s2139_s1 + $0x158] sm:$0xff]  ;;  %v398_v8 = vld [vmem:[%s2139_s1 + $0x1e0] sm:$0xff]  ;;  %v1335_v10 = vpack.c.bf16 %v349_v2, %v348_v1  ;;  %v1337_v14 = vpack.c.bf16 %v367_v7, %v366_v6 }
  0x1e   : > { %1330 = vmatprep.subr.bf16.mxu0 %v1329_v52  ;;  %v399_v9 = vld [vmem:[%s2139_s1 + $0x1e8] sm:$0xff]  ;;  %v350_v11 = vld [vmem:[%s2139_s1 + $0x60] sm:$0xff]  ;;  %v1367_v13 = vpack.c.bf16 %v381_v5, %v380_v3  ;;  %v368_v19 = vld [vmem:[%s2139_s1 + $0xf0] sm:$0xff] }
  0x1f   : > { %1360 = vmatpush3.bf16.msra.mxu1 %v1359_v51  ;;  %v332_v12 = vld [vmem:[%s1808_s26 + $0x8] sm:$0xff]  ;;  %v382_v16 = vld [vmem:[%s2139_s1 + $0x160] sm:$0xff]  ;;  %v1369_v18 = vpack.c.bf16 %v399_v9, %v398_v8  ;;  %v369_v20 = vld [vmem:[%s2139_s1 + $0xf8] sm:$0xff] }
  0x20   : > { %1362 = vmatprep.subr.bf16.mxu1 %v1361_v56  ;;  %v351_v15 = vld [vmem:[%s2139_s1 + $0x68] sm:$0xff]  ;;  %511 = vmatprep.mubr.f32.mxu0 %v332_v12  ;;  %v334_v21 = vld [vmem:[%s1808_s26 + $0x18] sm:$0xff]  ;;  %v400_v22 = vld [vmem:[%s2139_s1 + $0x1f0] sm:$0xff]  ;;  %v1341_v26 = vpack.c.bf16 %v369_v20, %v368_v19 }
  0x21   : > { %1332 = vmatpush3.bf16.msra.mxu0 %v1331_v62  ;;  %v383_v17 = vld [vmem:[%s2139_s1 + $0x168] sm:$0xff]  ;;  %v401_v23 = vld [vmem:[%s2139_s1 + $0x1f8] sm:$0xff]  ;;  %581 = vmatprep.mubr.f32.mxu1 %v334_v21  ;;  %v1339_v24 = vpack.c.bf16 %v351_v15, %v350_v11  ;;  %v352_v27 = vld [vmem:[%s2139_s1 + $0x70] sm:$0xff] }
  0x22   : > { %1334 = vmatprep.subr.bf16.mxu0 %v1333_v0  ;;  %v1371_v25 = vpack.c.bf16 %v383_v17, %v382_v16  ;;  %v353_v28 = vld [vmem:[%s2139_s1 + $0x78] sm:$0xff]  ;;  %v384_v29 = vld [vmem:[%s2139_s1 + $0x170] sm:$0xff]  ;;  %v1373_v30 = vpack.c.bf16 %v401_v23, %v400_v22  ;;  %v418_v32 = vld [vmem:[%s2139_s1 + $0x280] sm:$0xff] }
  0x23   : > { %1364 = vmatpush3.bf16.msra.mxu1 %v1363_v63  ;;  %v385_v31 = vld [vmem:[%s2139_s1 + $0x178] sm:$0xff]  ;;  %v419_v33 = vld [vmem:[%s2139_s1 + $0x288] sm:$0xff]  ;;  %v1343_v34 = vpack.c.bf16 %v353_v28, %v352_v27  ;;  %v402_v37 = vld [vmem:[%s2139_s1 + $0x200] sm:$0xff] }
  0x24   : > { %1366 = vmatprep.subr.bf16.mxu1 %v1365_v4  ;;  %v1375_v35 = vpack.c.bf16 %v385_v31, %v384_v29  ;;  %v1377_v36 = vpack.c.bf16 %v419_v33, %v418_v32  ;;  %v403_v38 = vld [vmem:[%s2139_s1 + $0x208] sm:$0xff]  ;;  %v420_v39 = vld [vmem:[%s2139_s1 + $0x290] sm:$0xff]  ;;  %v421_v40 = vld [vmem:[%s2139_s1 + $0x298] sm:$0xff] }
  0x25   : > { %1336 = vmatpush3.bf16.msra.mxu0 %v1335_v10  ;;  %v331_v41 = vld [vmem:[%s1808_s26] sm:$0xff]  ;;  %v1379_v42 = vpack.c.bf16 %v403_v38, %v402_v37  ;;  %v333_v43 = vld [vmem:[%s1808_s26 + $0x10] sm:$0xff]  ;;  %v1381_v45 = vpack.c.bf16 %v421_v40, %v420_v39  ;;  %v405_v46 = vld [vmem:[%s2139_s1 + $0x218] sm:$0xff] }
  0x26   : > { %1338 = vmatprep.subr.bf16.mxu0 %v1337_v14  ;;  %v404_v44 = vld [vmem:[%s2139_s1 + $0x210] sm:$0xff]  ;;  %v422_v47 = vld [vmem:[%s2139_s1 + $0x2a0] sm:$0xff]  ;;  %v423_v48 = vld [vmem:[%s2139_s1 + $0x2a8] sm:$0xff] }
  0x27   : > { %1368 = vmatpush3.bf16.msra.mxu1 %v1367_v13  ;;  %v336_v49 = vld [vmem:[%s1808_s26 + $0x28] sm:$0xff]  ;;  %v434_v51 = vld [vmem:[%s2139_s1 + $0x300] sm:$0xff]  ;;  %v1383_v54 = vpack.c.bf16 %v405_v46, %v404_v44  ;;  %v1385_v55 = vpack.c.bf16 %v423_v48, %v422_v47  ;;  %v424_v58 = vld [vmem:[%s2139_s1 + $0x2b0] sm:$0xff] }
  0x28   : > { %1370 = vmatprep.subr.bf16.mxu1 %v1369_v18  ;;  %v435_v52 = vld [vmem:[%s2139_s1 + $0x308] sm:$0xff]  ;;  %v406_v56 = vld [vmem:[%s2139_s1 + $0x220] sm:$0xff]  ;;  %v425_v59 = vld [vmem:[%s2139_s1 + $0x2b8] sm:$0xff] }
  0x29   : > { %1340 = vmatpush3.bf16.msra.mxu0 %v1339_v24  ;;  %v1410_v53 = vpack.c.bf16 %v435_v52, %v434_v51  ;;  %v407_v57 = vld [vmem:[%s2139_s1 + $0x228] sm:$0xff]  ;;  %v337_v61 = vld [vmem:[%s1808_s26 + $0x30] sm:$0xff]  ;;  %v1389_v63 = vpack.c.bf16 %v425_v59, %v424_v58  ;;  %v409_v1 = vld [vmem:[%s2139_s1 + $0x238] sm:$0xff] }
  0x2a   : > { %1342 = vmatprep.subr.bf16.mxu0 %v1341_v26  ;;  %v1387_v62 = vpack.c.bf16 %v407_v57, %v406_v56  ;;  %v408_v0 = vld [vmem:[%s2139_s1 + $0x230] sm:$0xff]  ;;  %v426_v2 = vld [vmem:[%s2139_s1 + $0x2c0] sm:$0xff]  ;;  %v427_v3 = vld [vmem:[%s2139_s1 + $0x2c8] sm:$0xff] }
  0x2b   : > { %1372 = vmatpush3.bf16.msra.mxu1 %v1371_v25  ;;  %v1391_v4 = vpack.c.bf16 %v409_v1, %v408_v0  ;;  %v1393_v5 = vpack.c.bf16 %v427_v3, %v426_v2  ;;  %v410_v6 = vld [vmem:[%s2139_s1 + $0x240] sm:$0xff]  ;;  %v411_v7 = vld [vmem:[%s2139_s1 + $0x248] sm:$0xff]  ;;  %v428_v8 = vld [vmem:[%s2139_s1 + $0x2d0] sm:$0xff] }
  0x2c   : > { %1374 = vmatprep.subr.bf16.mxu1 %v1373_v30  ;;  %v429_v9 = vld [vmem:[%s2139_s1 + $0x2d8] sm:$0xff]  ;;  %v1395_v10 = vpack.c.bf16 %v411_v7, %v410_v6  ;;  %v412_v12 = vld [vmem:[%s2139_s1 + $0x250] sm:$0xff]  ;;  %v430_v14 = vld [vmem:[%s2139_s1 + $0x2e0] sm:$0xff] }
  0x2d   : > { %1344 = vmatpush3.bf16.msra.mxu0 %v1343_v34  ;;  %v1397_v11 = vpack.c.bf16 %v429_v9, %v428_v8  ;;  %v413_v13 = vld [vmem:[%s2139_s1 + $0x258] sm:$0xff]  ;;  %v431_v15 = vld [vmem:[%s2139_s1 + $0x2e8] sm:$0xff]  ;;  %v414_v18 = vld [vmem:[%s2139_s1 + $0x260] sm:$0xff] }
  0x2e   : > { %1378 = vmatprep.subr.bf16.mxu0 %v1377_v36  ;;  %v1399_v16 = vpack.c.bf16 %v413_v13, %v412_v12  ;;  %v1401_v17 = vpack.c.bf16 %v431_v15, %v430_v14  ;;  %v415_v19 = vld [vmem:[%s2139_s1 + $0x268] sm:$0xff]  ;;  %v432_v20 = vld [vmem:[%s2139_s1 + $0x2f0] sm:$0xff]  ;;  %v433_v21 = vld [vmem:[%s2139_s1 + $0x2f8] sm:$0xff] }
  0x2f   : > { %1376 = vmatpush3.bf16.msra.mxu1 %v1375_v35  ;;  %v1403_v22 = vpack.c.bf16 %v415_v19, %v414_v18  ;;  %v1405_v23 = vpack.c.bf16 %v433_v21, %v432_v20  ;;  %v416_v24 = vld [vmem:[%s2139_s1 + $0x270] sm:$0xff]  ;;  %v417_v25 = vld [vmem:[%s2139_s1 + $0x278] sm:$0xff]  ;;  %v335_v27 = vld [vmem:[%s1808_s26 + $0x20] sm:$0xff]  ;;  %s325_s26 = scalar_lea.vmem [#allocation2], %s1088_s16  ;;  %s1495_s16 = sshll.u32 %s1558_s13, 4  ;;  %s1496_s16 = int_to_ptr.vmem [resolvable:$false] %s1495_s16 }
  0x30   : > { %1409 = vmatprep.subr.bf16.mxu1 %v1555_v50  ;;  %512 = vmatmul.mubr.f32.vlgmr.msra.gmra.mrb[0].mxu0 %v331_v41  ;;  %v1407_v26 = vpack.c.bf16 %v417_v25, %v416_v24  ;;  %v728_v28 = vld [vmem:[%s2141_s3] sm:$0xff]  ;;  %v729_v29 = vld [vmem:[%s2141_s3 + $0x8] sm:$0xff]  ;;  %v730_v31 = vld [vmem:[%s2141_s3 + $0x10] sm:$0xff]  ;;  %s1025_s29 = sshll.u32 %s325_s26, 4  ;;  %s1497_s17 = scalar_lea.vmem %s1496_s16, 256  ;;  %s2098_s29 = int_to_ptr.vmem [resolvable:$true] %s1025_s29 }
  0x31   : > { %1380 = vmatpush3.bf16.msra.mxu0 %v1379_v42  ;;  %651 = vmatprep.mubr.f32.mxu0 %v336_v49  ;;  %v1413_v30 = vpack.c.bf16 %v729_v29, %v728_v28  ;;  %v731_v32 = vld [vmem:[%s2141_s3 + $0x18] sm:$0xff]  ;;  %v732_v34 = vld [vmem:[%s2141_s3 + $0x20] sm:$0xff]  ;;  %v733_v35 = vld [vmem:[%s2141_s3 + $0x28] sm:$0xff]  ;;  %s1491_s28 = scalar_lea.vmem %s2098_s29, 128  ;;  %p1498_p0 = scmp.lt.s32.totalorder %s2098_s29, %s1496_s16 }
  0x32   : > { %582 = vmatmul.mubr.f32.vlgmr.msra.gmra.mrb[0].mxu1 %v333_v43  ;;  %1382 = vmatprep.subr.bf16.mxu0 %v1381_v45  ;;  %v1416_v33 = vpack.c.bf16 %v731_v32, %v730_v31  ;;  %v1419_v36 = vpack.c.bf16 %v733_v35, %v732_v34  ;;  %v734_v37 = vld [vmem:[%s2141_s3 + $0x30] sm:$0x3]  ;;  %v1090_v39 = vld [vmem:[%s2140_s2] ss:$0 sm:$0xff]  ;;  %v826_v0 = vld [vmem:[%s2143_s5 + $0x28] sm:$0xff]  ;;  %p1492_p11 = scmp.ne.s32.totalorder %s2098_s29, %s1491_s28  ;;  %p1499_p1 = scmp.lt.s32.totalorder %s1497_s17, %s1491_s28 }
  0x33   : > { %1411 = vmatpush3.bf16.msra.mxu1 %v1410_v53  ;;  %1247 = vmatprep.mubr.msk.f32.mxu1 %vm1556_vm0, %v1557_v60  ;;  %v823_v59 = vld [vmem:[%s2143_s5 + $0x10] sm:$0xff]  ;;  %v828_v3 = vld [vmem:[%s2143_s5 + $0x38] sm:$0xff]  ;;  %v830_v6 = vld [vmem:[%s2143_s5 + $0x48] sm:$0xff] }
  0x34   : > { %1412 = vmatprep.subr.bf16.mxu1 %v1555_v50  ;;  %v827_v2 = vld [vmem:[%s2143_s5 + $0x30] sm:$0xff]  ;;  %v832_v9 = vld [vmem:[%s2143_s5 + $0x58] sm:$0xff]  ;;  %v920_v12 = vld [vmem:[%s2145_s7] sm:$0xff]  ;;  %p1493_p12 = pnand %p1492_p11, %p1647_p5  ;;  %p1500_p2 = por %p1499_p1, %p1498_p0 }
  0x35   : > { %1384 = vmatpush3.bf16.msra.mxu0 %v1383_v54  ;;  %v821_v54 = vld [vmem:[%s2143_s5] sm:$0xff]  ;;  %v831_v8 = vld [vmem:[%s2143_s5 + $0x50] sm:$0xff]  ;;  %v921_v13 = vld [vmem:[%s2145_s7 + $0x8] sm:$0xff] }
  0x36   : > { %1386 = vmatprep.subr.bf16.mxu0 %v1385_v55  ;;  %1248 = vmatmul.mubr.msk.f32.vlgmr.msra.gmra.mrb[2].mxu1 %vm443_vm1, %v337_v61  ;;  %v822_v55 = vld [vmem:[%s2143_s5 + $0x8] sm:$0xff]  ;;  %v824_v61 = vld [vmem:[%s2143_s5 + $0x18] sm:$0xff]  ;;  %v922_v14 = vld [vmem:[%s2145_s7 + $0x10] sm:$0xff]  ;;  %v1440_v15 = vpack.c.bf16 %v921_v13, %v920_v12  ;;  %p1494_p13 = pneg %p1493_p12 }
  0x37   : > { %1264 = vmatprep.mubr.msk.f32.mxu1 %vm1556_vm0, %v1557_v60  ;;  %1414 = vmatpush3.bf16.msra.mxu1 %v1413_v30  ;;  %v1422_v57 = vpack.c.bf16 %v822_v55, %v821_v54  ;;  %v1092_v18 = vld [vmem:[%s2142_s4] ss:$0 sm:$0xff]  ;;  %v926_v25 = vld [vmem:[%s2145_s7 + $0x30] sm:$0x3] }
  0x38   : > { %1415 = vmatprep.subr.bf16.mxu1 %v1555_v50  ;;  %p1501_p3 = pnand %p1500_p2, %p1494_p13 }
  0x39   : > { %1388 = vmatpush3.bf16.msra.mxu0 %v1387_v62  ;;  %v1425_v62 = vpack.c.bf16 %v824_v61, %v823_v59 }
  0x3a   : > { %1390 = vmatprep.subr.bf16.mxu0 %v1389_v63  ;;  %v825_v63 = vld [vmem:[%s2143_s5 + $0x20] sm:$0xff] }
  0x3b   : > { %1417 = vmatpush3.bf16.msra.mxu1 %v1416_v33  ;;  %v1428_v1 = vpack.c.bf16 %v826_v0, %v825_v63 }
  0x3c   : > { %1418 = vmatprep.subr.bf16.mxu1 %v1555_v50 }
  0x3d   : > { %1392 = vmatpush3.bf16.msra.mxu0 %v1391_v4  ;;  %v1431_v4 = vpack.c.bf16 %v828_v3, %v827_v2 }
  0x3e   : > { %1394 = vmatprep.subr.bf16.mxu0 %v1393_v5  ;;  %v829_v5 = vld [vmem:[%s2143_s5 + $0x40] sm:$0xff] }
  0x3f   : > { %1420 = vmatpush3.bf16.msra.mxu1 %v1419_v36  ;;  %v1434_v7 = vpack.c.bf16 %v830_v6, %v829_v5 }
  0x40   : > { %1262 = vmatprep.subr.mxu1 %v1557_v60 }
  0x41   : > { %1396 = vmatpush3.bf16.msra.mxu0 %v1395_v10  ;;  %v1437_v10 = vpack.c.bf16 %v832_v9, %v831_v8 }
  0x42   : > { %1398 = vmatprep.subr.bf16.mxu0 %v1397_v11  ;;  %v833_v11 = vld [vmem:[%s2143_s5 + $0x60] sm:$0xf] }
  0x43   : > { %1263 = vmatpush3.msk.msra.mxu1 %vm746_vm2, %v734_v37 }
  0x44   : > { %1421 = vmatprep.subr.bf16.mxu1 %v1555_v50 }
  0x45   : > { %1400 = vmatpush3.bf16.msra.mxu0 %v1399_v16  ;;  %v923_v16 = vld [vmem:[%s2145_s7 + $0x18] sm:$0xff] }
  0x46   : > { %1402 = vmatprep.subr.bf16.mxu0 %v1401_v17  ;;  %v1443_v17 = vpack.c.bf16 %v923_v16, %v922_v14 }
  0x49   : > { %1404 = vmatpush3.bf16.msra.mxu0 %v1403_v22 }
  0x4a   : > { %1406 = vmatprep.subr.bf16.mxu0 %v1405_v23  ;;  %v924_v23 = vld [vmem:[%s2145_s7 + $0x20] sm:$0xff] }
  0x4d   : > { %1408 = vmatpush3.bf16.msra.mxu0 %v1407_v26  ;;  %v1095_v26 = vld [vmem:[%s2144_s6] ss:$0 sm:$0xff] }
  0x4e   : > { %1439 = vmatprep.subr.bf16.mxu0 %v1555_v50 }
  0x50   : > { %652 = vmatmul.mubr.f32.vlgmr.msra.gmra.mrb[2].mxu0 %v335_v27 }
  0x51   : > { %1310 = vmatprep.mubr.msk.f32.mxu0 %vm1556_vm0, %v1557_v60  ;;  %1441 = vmatpush3.bf16.msra.mxu0 %v1440_v15 }
  0x52   : > { %1442 = vmatprep.subr.bf16.mxu0 %v1555_v50 }
  0x55   : > { %1444 = vmatpush3.bf16.msra.mxu0 %v1443_v17 }
  0x56   : > { %1445 = vmatprep.subr.bf16.mxu0 %v1555_v50 }
 0x103   : > { %v1137_v38 = vpop.f32.mrb[0].mxu0 }
 0x104   : > { %v1138_v40 = vpop.f32.mrb[1].mxu0 }
 0x105   : > { %v1172_v41 = vpop.f32.mrb[0].mxu1  ;;  %v1139_v42 = vadd.f32 %v1138_v40, %v1137_v38 }
 0x106   : > { %v1173_v43 = vpop.f32.mrb[1].mxu1 }
 0x107   : > { %v1174_v44 = vadd.f32 %v1173_v43, %v1172_v41  ;;  %v514_v45 = vadd.f32 %v1139_v42, %v1090_v39 }
 0x109   : > { %v584_v46 = vadd.f32 %v1174_v44, %v514_v45  ;;  %v723_v47 = vpop.f32.mrb[2].mxu1 }
 0x10a   : > { %v1249_v48 = vpop.f32.mrb[3].mxu1 }
 0x123   : > { %v1207_v49 = vpop.f32.mrb[2].mxu0 }
 0x124   : > { %v1208_v51 = vpop.f32.mrb[3].mxu0 }
 0x125   : > { %v1209_v52 = vadd.f32 %v1208_v51, %v1207_v49 }
 0x127   : > { %v654_v53 = vadd.f32 %v1209_v52, %v584_v46 }
 0x129   : > { %v724_v56 = vadd.f32 %v723_v47, %v654_v53 }
 0x12b   : > { %v727_v58 = vmax.f32 %v724_v56, 0.0 }
 0x12d   : > { %1265 = vmatmul.mubr.msk.f32.vlgmr.msra.gmra.mrb[4].mxu1 %vm742_vm3, %v727_v58 }
 0x12e   : > { %1423 = vmatpush3.bf16.msra.mxu1 %v1422_v57  ;;  %1293 = vmatprep.mubr.msk.f32.mxu1 %vm1556_vm0, %v1557_v60 }
 0x12f   : > { %1424 = vmatprep.subr.bf16.mxu1 %v1555_v50 }
 0x132   : > { %1426 = vmatpush3.bf16.msra.mxu1 %v1425_v62 }
 0x133   : > { %1427 = vmatprep.subr.bf16.mxu1 %v1555_v50 }
 0x136   : > { %1429 = vmatpush3.bf16.msra.mxu1 %v1428_v1 }
 0x137   : > { %1430 = vmatprep.subr.bf16.mxu1 %v1555_v50 }
 0x13a   : > { %1432 = vmatpush3.bf16.msra.mxu1 %v1431_v4 }
 0x13b   : > { %1433 = vmatprep.subr.bf16.mxu1 %v1555_v50 }
 0x13e   : > { %1435 = vmatpush3.bf16.msra.mxu1 %v1434_v7 }
 0x13f   : > { %1436 = vmatprep.subr.bf16.mxu1 %v1555_v50  ;;  %v925_v50 = vld [vmem:[%s2145_s7 + $0x28] sm:$0xff] }
 0x140   : > { %v1446_v24 = vpack.c.bf16 %v925_v50, %v924_v23 }
 0x142   : > { %1438 = vmatpush3.bf16.msra.mxu1 %v1437_v10  ;;  %1447 = vmatpush3.bf16.msra.mxu0 %v1446_v24 }
 0x143   : > { %1291 = vmatprep.subr.mxu1 %v1557_v60  ;;  %1308 = vmatprep.subr.mxu0 %v1557_v60  ;;  %v1098_v60 = vld [vmem:[%s2146_s8] ss:$0 sm:$0xff] }
 0x146   : > { %1292 = vmatpush3.msk.msra.mxu1 %vm845_vm4, %v833_v11  ;;  %1309 = vmatpush3.msk.msra.mxu0 %vm746_vm2, %v926_v25 }
 0x200   : > { %v816_v19 = vpop.f32.mrb[4].mxu1 }
 0x201   : > { %v817_v20 = vadd.f32 %v1092_v18, %v816_v19  ;;  %v1266_v21 = vpop.f32.mrb[5].mxu1 }
 0x203   : > { %v820_v22 = vmax.f32 %v817_v20, 0.0 }
 0x205   : > { %1294 = vmatmul.mubr.msk.f32.vlgmr.msra.gmra.mrb[6].mxu1 %vm841_vm5, %v820_v22 }
 0x2d8   : > { %v915_v27 = vpop.f32.mrb[6].mxu1 }
 0x2d9   : > { %v916_v28 = vadd.f32 %v1095_v26, %v915_v27  ;;  %v1295_v29 = vpop.f32.mrb[7].mxu1 }
 0x2db   : > { %v919_v30 = vmax.f32 %v916_v28, 0.0 }
 0x2dd   : > { %1311 = vmatmul.mubr.msk.f32.vlgmr.msra.gmra.mrb[4].mxu0 %vm742_vm3, %v919_v30 }
 0x3b0   : > { %v1006_v31 = vpop.f32.mrb[4].mxu0 }
 0x3b1   : > { %v1007_v32 = vadd.f32 %v1098_v60, %v1006_v31  ;;  %v1312_v33 = vpop.f32.mrb[5].mxu0 }
 0x3b3   : > { %1010 = vst [vmem:[%s325_s26] sm:$0xff] %v1007_v32 }
 0x3b4   : > { %1504 = shalt.err (!%p1501_p3)
}
 0x3b5   : > { %s1505_s14 = scalar_lea.hbm %s2096_s27, 128  ;;  %s1509_s26 = scalar_lea.hbm %s2147_s9, 256 }
 0x3b6   : > { %p1506_p4 = scmp.ne.s32.totalorder %s2096_s27, %s1505_s14  ;;  %p1510_p9 = scmp.lt.u32.totalorder %s2096_s27, %s2147_s9 }
 0x3b7   : > { %p1511_p10 = scmp.lt.u32.totalorder %s1509_s26, %s1505_s14  ;;  %p1513_p12 = scmp.lt.u32.totalorder %s1505_s14, %s2096_s27 }
 0x3b8   : > { %p1507_p7 = pnand %p1506_p4, %p1647_p5 }
 0x3b9   : > { %p1512_p11 = por %p1511_p10, %p1510_p9 }
 0x3ba   : > { %p1508_p8 = pneg %p1507_p7 }
 0x3bb   : > { %p1514_p13 = por %p1513_p12, %p1512_p11 }
 0x3bd   : > { %p1515_p0 = pnand %p1514_p13, %p1508_p8 }
 0x3bf   : > { %1518 = shalt.err (!%p1515_p0)
}
 0x3c0   : > { %1449 = dma.vmem_to_hbm [thread:$0]  (%p1647_p5), %s2098_s29, 128, %s2096_s27, %s1012_s21  }
 0x3c1 PF: > { %p1455_p1 = scmp.ge.s32.totalorder %s1553_s12, 2  ;;  %s1037_s28 = sand.u32 1, %s1541_s30  }
 0x3c2   : > { %s1038_s13 = scalar_lea.sflag [#allocation3], %s1037_s28 }
 0x3c3   : > { %p1452_p2 = pnand %p1455_p1, %p1651_p6 }
 0x3c5   : > { %1536 = dma.done.wait (!%p1452_p2), %s1038_s13, 128  }
 0x3c6   : > { %1538 = vsyncadd (!%p1452_p2), %s1038_s13, 4294967168  ;;  %p19_p3 = scmp.ge.s32.totalorder %s1634_s15, 4   ;;  %s2150_s30 = smov %s1545_s10 }
 0x3c7   : > { %s2151_s10 = smov %s1549_s11  ;;  %s2152_s11 = smov %s1645_s18 }
 0x3c8   : > { %s2153_s12 = smov %s1634_s15  ;;  %21 = sbr.rel (!%p19_p3) target bundleno = 3 (0x3), region = 91 }
 0x3cf   :  { %1043 = vsyncpa [#allocation3], 1 }
 0x3d0   :  { %1045 = vsyncpa [#allocation3 + $0x1], 1 }

</bundles_post_ra>
